<compile_context>
chip_gen: v5e
topology: v5e:2x2
jax: 0.10.0
libtpu: 0.0.40
codegen_flags: <defaults>
</compile_context>

<pallas_src>
import functools
import math

import jax
import jax.numpy as jnp
from jax import lax
from jax.experimental import pallas as pl
from jax.experimental.pallas import tpu as pltpu


_VMEM_CAP_CACHE = [None]


def _vmem_capacity_bytes():
    """Per-chip VMEM capacity (falls back to the v7x 64 MiB floor)."""
    if _VMEM_CAP_CACHE[0] is None:
        cap = 64 << 20
        try:
            info = pltpu.get_tpu_info()
            cap = int(getattr(info, "vmem_capacity_bytes", cap) or cap)
        except Exception:
            pass
        _VMEM_CAP_CACHE[0] = cap
    return _VMEM_CAP_CACHE[0]


def _packing_factor(H):
    """How many original rows of width H pack into one 128-lane row."""
    return 128 // H if (H < 128 and 128 % H == 0) else 1


def _costeff_output_kernel(h_ref, w_ref, b_ref, res_ref, gamma_ref, beta_ref,
                           seg_ref, o_ref, *, eps, inv_h):
    # Linear on packed rows: (tmp, p*I) @ block-diagonal (p*I, p*H) == per-row x @ W^T.
    x = jnp.dot(h_ref[...], w_ref[...], preferred_element_type=jnp.float32)
    # TODO(synk): dropout is identity in inference; training dropout would use pltpu PRNG.
    x = x + b_ref[...] + res_ref[...].astype(jnp.float32)

    # Per-original-row LayerNorm stats via ONE stacked MXU segment-reduce:
    # rows [:t] give E[x], rows [t:] give E[x^2]; var = E[x^2] - mean^2 (clamped).
    t = x.shape[0]
    stacked = jnp.concatenate([x, x * x], axis=0)
    sums = jnp.dot(stacked, seg_ref[...], preferred_element_type=jnp.float32) * inv_h
    mean = sums[:t]
    var = jnp.maximum(sums[t:] - mean * mean, 0.0)
    inv = lax.rsqrt(var + eps)
    y = (x - mean) * inv * gamma_ref[...] + beta_ref[...]
    o_ref[...] = y.astype(o_ref.dtype)


@functools.partial(
    jax.jit,
    static_argnames=("eps", "block_rows", "compute_dtype", "out_dtype"))
def _costeff_apply(hidden_states, input_tensor, w_block, b_t, g_t, be_t, seg,
                   *, eps, block_rows, compute_dtype, out_dtype):
    cdt = jnp.dtype(compute_dtype)
    odt = jnp.dtype(out_dtype)
    *lead, I = hidden_states.shape
    H = input_tensor.shape[-1]
    M = 1
    for d in lead:
        M *= d
    p = _packing_factor(H)
    Ip, Hp = p * I, p * H

    # Pad only to a whole packed row (<= p-1 rows).  The ragged last grid tile is
    # handled by Pallas (garbage OOB input rows stay within their own packed row
    # and their outputs are masked / sliced off).
    Mp = pl.cdiv(M, p)
    M_pack = Mp * p
    h2d = hidden_states.reshape(M, I).astype(cdt)
    r2d = input_tensor.reshape(M, H).astype(cdt)
    if M_pack > M:
        h2d = jnp.pad(h2d, ((0, M_pack - M), (0, 0)))
        r2d = jnp.pad(r2d, ((0, M_pack - M), (0, 0)))
    h_packed = h2d.reshape(Mp, Ip)
    r_packed = r2d.reshape(Mp, Hp)

    # Streamed row tile: sublane-aligned (16 for sub-32-bit compute, 8 for f32)
    # and capped at ceil(Mp/2) so the grid has >= 2 steps whenever possible
    # (lets "parallel" shard row tiles across v7x's two TensorCores).
    sub = 8 if cdt.itemsize >= 4 else 16
    if Mp > sub:
        tmp = min(int(block_rows), pl.cdiv(Mp, 2))
        tmp = max(sub, (tmp // sub) * sub)
    else:
        tmp = Mp
    grid = (pl.cdiv(Mp, tmp),)

    cbytes = cdt.itemsize
    obytes = odt.itemsize
    vmem_est = (2 * tmp * Ip * cbytes                  # double-buffered activation tile
                + 2 * tmp * Hp * cbytes                # double-buffered residual tile
                + 2 * tmp * Hp * obytes                # double-buffered output tile
                + 2 * (Ip * Hp * cbytes + Hp * Hp * 4 + 3 * Hp * 4)   # resident params
                + 8 * tmp * Hp * 4)                    # in-kernel f32 temporaries
    cap = _vmem_capacity_bytes()
    vmem_limit = int(min(max(2 * vmem_est, 32 << 20), cap - (8 << 20)))

    cost = pl.CostEstimate(
        flops=2 * Mp * Hp * (Ip + 2 * Hp),
        transcendentals=Mp * Hp,
        bytes_accessed=(cbytes * (Mp * Ip + Mp * Hp + Ip * Hp)
                        + 4 * (Hp * Hp + 3 * Hp)
                        + obytes * Mp * Hp),
    )

    kernel = functools.partial(_costeff_output_kernel, eps=float(eps), inv_h=1.0 / H)
    out = pl.pallas_call(
        kernel,
        out_shape=jax.ShapeDtypeStruct((Mp, Hp), odt),
        grid_spec=pltpu.PrefetchScalarGridSpec(
            num_scalar_prefetch=0,
            grid=grid,
            in_specs=[
                pl.BlockSpec((tmp, Ip), lambda i: (i, 0)),   # streamed activations
                pl.BlockSpec((Ip, Hp), lambda i: (0, 0)),    # resident block-diag weight
                pl.BlockSpec((1, Hp), lambda i: (0, 0)),     # resident bias (f32)
                pl.BlockSpec((tmp, Hp), lambda i: (i, 0)),   # streamed residual
                pl.BlockSpec((1, Hp), lambda i: (0, 0)),     # resident LN gamma (f32)
                pl.BlockSpec((1, Hp), lambda i: (0, 0)),     # resident LN beta (f32)
                pl.BlockSpec((Hp, Hp), lambda i: (0, 0)),    # resident segment matrix (f32)
            ],
            out_specs=pl.BlockSpec((tmp, Hp), lambda i: (i, 0)),
        ),
        compiler_params=pltpu.CompilerParams(
            dimension_semantics=("parallel",),   # v7x: shard row tiles over both TCs
            vmem_limit_bytes=vmem_limit,
        ),
        cost_estimate=cost,
    )(h_packed, w_block, b_t, r_packed, g_t, be_t, seg)

    out2d = out.reshape(M_pack, H)
    if M_pack > M:
        out2d = out2d[:M]
    return out2d.reshape(*lead, H)


def make_costeff_output(weight, bias, gamma, beta, *, eps=1e-12, block_rows=1024,
                        compute_dtype=jnp.bfloat16, out_dtype=None):
    """Build constants once per weight set; return apply(hidden_states, input_tensor).

    weight: (H, I) nn.Linear weight (PyTorch layout); bias/gamma/beta: (H,).
    compute_dtype: dtype of streamed activations/weight (bf16 by default,
    halving HBM traffic); LayerNorm statistics are always computed in f32.
    """
    H, I = weight.shape
    cdt = jnp.dtype(compute_dtype)
    odt = jnp.dtype(out_dtype if out_dtype is not None else compute_dtype)
    p = _packing_factor(H)
    Ip, Hp = p * I, p * H

    # Block-diagonal weight so the packed matmul equals per-original-row x @ W^T.
    w_t = weight.T.astype(cdt)                                    # (I, H)
    w_block = jnp.kron(jnp.eye(p, dtype=cdt), w_t) if p > 1 else w_t
    b_t = jnp.tile(bias.astype(jnp.float32), p).reshape(1, Hp)
    g_t = jnp.tile(gamma.astype(jnp.float32), p).reshape(1, Hp)
    be_t = jnp.tile(beta.astype(jnp.float32), p).reshape(1, Hp)
    # seg[a, c] = 1 iff columns a and c belong to the same original row (data-independent).
    seg_ids = jnp.arange(Hp, dtype=jnp.int32) // H
    seg = (seg_ids[:, None] == seg_ids[None, :]).astype(jnp.float32)
    w_block, b_t, g_t, be_t, seg = jax.block_until_ready(
        (w_block, b_t, g_t, be_t, seg))

    def apply(hidden_states, input_tensor):
        return _costeff_apply(hidden_states, input_tensor,
                              w_block, b_t, g_t, be_t, seg,
                              eps=float(eps), block_rows=int(block_rows),
                              compute_dtype=cdt.name, out_dtype=odt.name)

    return apply


def reference(hidden_states, input_tensor, weight, bias, gamma, beta, eps):
    x = hidden_states @ weight.T + bias
    x = x + input_tensor
    mean = jnp.mean(x, axis=-1, keepdims=True)
    var = jnp.mean((x - mean) ** 2, axis=-1, keepdims=True)
    return (x - mean) * lax.rsqrt(var + eps) * gamma + beta


if __name__ == "__main__":
    # Config: prun_intermediate_size=64, hidden_size=32, layer_norm_eps=1e-12.
    batch, seq = 2, 56            # M = 112 -> packed rows Mp = 28 (ragged multi-step grid)
    I, H = 64, 32
    eps = 1e-12

    key = jax.random.PRNGKey(0)
    k_h, k_r, k_w, k_b, k_g, k_be = jax.random.split(key, 6)
    hidden_states = jax.random.normal(k_h, (batch, seq, I), dtype=jnp.float32)
    input_tensor = jax.random.normal(k_r, (batch, seq, H), dtype=jnp.float32)
    weight = jax.random.normal(k_w, (H, I), dtype=jnp.float32) / math.sqrt(I)
    bias = 0.01 * jax.random.normal(k_b, (H,), dtype=jnp.float32)
    gamma = 1.0 + 0.01 * jax.random.normal(k_g, (H,), dtype=jnp.float32)
    beta = 0.01 * jax.random.normal(k_be, (H,), dtype=jnp.float32)

    ref = reference(hidden_states, input_tensor, weight, bias, gamma, beta, eps)

    # 1) f32 path, tiny tile -> multi-step ragged grid; tight tolerance.
    f32_fn = make_costeff_output(weight, bias, gamma, beta, eps=eps, block_rows=8,
                                 compute_dtype=jnp.float32, out_dtype=jnp.float32)
    out_f32 = jax.block_until_ready(f32_fn(hidden_states, input_tensor))
    assert out_f32.shape == ref.shape
    assert jnp.allclose(out_f32, ref, atol=1e-4, rtol=1e-4), "mismatch (f32 tiled)"

    # 2) default bf16 fast path (halved HBM traffic, >=2 grid steps); loose tolerance.
    bf16_fn = make_costeff_output(weight, bias, gamma, beta, eps=eps)
    out_bf16 = jax.block_until_ready(bf16_fn(hidden_states, input_tensor))
    assert out_bf16.shape == ref.shape
    assert out_bf16.dtype == jnp.bfloat16
    assert jnp.allclose(out_bf16.astype(jnp.float32), ref, atol=3e-2, rtol=3e-2), \
        "mismatch (bf16)"

    # 3) toy single-block shape (batch=2, seq=8) exercising the full-extent tile path.
    out_small = jax.block_until_ready(f32_fn(hidden_states[:, :8], input_tensor[:, :8]))
    ref_small = reference(hidden_states[:, :8], input_tensor[:, :8],
                          weight, bias, gamma, beta, eps)
    assert jnp.allclose(out_small, ref_small, atol=1e-4, rtol=1e-4), "mismatch (toy)"

    print("KERNEL_OK")
</pallas_src>

<mosaic_0001>
module attributes {stable_mosaic.version = 11 : i64} {
  func.func @_costeff_output_kernel(%arg0: i32, %arg1: memref<8x256xf32, #tpu.memory_space<vmem>>, %arg2: memref<256x128xf32, #tpu.memory_space<vmem>>, %arg3: memref<1x128xf32, #tpu.memory_space<vmem>>, %arg4: memref<8x128xf32, #tpu.memory_space<vmem>>, %arg5: memref<1x128xf32, #tpu.memory_space<vmem>>, %arg6: memref<1x128xf32, #tpu.memory_space<vmem>>, %arg7: memref<128x128xf32, #tpu.memory_space<vmem>>, %arg8: memref<8x128xf32, #tpu.memory_space<vmem>>) attributes {dimension_semantics = [#tpu.dimension_semantics<parallel>], iteration_bounds = array<i64: 4>, scalar_prefetch = 0 : i64, scratch_operands = 0 : i64, tpu.core_type = #tpu.core_type<tc>, window_params = [{transform_indices = @transform_0, window_bounds = array<i64: 8, 256>}, {pipeline_mode = #tpu.pipeline_mode<synchronous>, transform_indices = @transform_1, window_bounds = array<i64: 256, 128>}, {pipeline_mode = #tpu.pipeline_mode<synchronous>, transform_indices = @transform_2, window_bounds = array<i64: 1, 128>}, {transform_indices = @transform_3, window_bounds = array<i64: 8, 128>}, {pipeline_mode = #tpu.pipeline_mode<synchronous>, transform_indices = @transform_4, window_bounds = array<i64: 1, 128>}, {pipeline_mode = #tpu.pipeline_mode<synchronous>, transform_indices = @transform_5, window_bounds = array<i64: 1, 128>}, {pipeline_mode = #tpu.pipeline_mode<synchronous>, transform_indices = @transform_6, window_bounds = array<i64: 128, 128>}, {transform_indices = @transform_7, window_bounds = array<i64: 8, 128>}]} {
    %c0 = arith.constant 0 : index
    %c0_0 = arith.constant 0 : index
    %0 = vector.load %arg1[%c0, %c0_0] : memref<8x256xf32, #tpu.memory_space<vmem>>, vector<8x256xf32>
    %c0_1 = arith.constant 0 : index
    %c0_2 = arith.constant 0 : index
    %1 = vector.load %arg2[%c0_1, %c0_2] : memref<256x128xf32, #tpu.memory_space<vmem>>, vector<256x128xf32>
    %cst = arith.constant dense<0.000000e+00> : vector<8x128xf32>
    %2 = tpu.matmul %0, %1, %cst {dimension_numbers = #tpu.dot_dimension_numbers<[1], [0], [0], [1], [0, 0, 1, 1], [], []>} : vector<8x256xf32>, vector<256x128xf32>, vector<8x128xf32> -> vector<8x128xf32>
    %c0_3 = arith.constant 0 : index
    %c0_4 = arith.constant 0 : index
    %3 = vector.load %arg3[%c0_3, %c0_4] : memref<1x128xf32, #tpu.memory_space<vmem>>, vector<1x128xf32>
    %4 = vector.broadcast %3 : vector<1x128xf32> to vector<8x128xf32>
    %5 = arith.addf %2, %4 : vector<8x128xf32>
    %c0_5 = arith.constant 0 : index
    %c0_6 = arith.constant 0 : index
    %6 = vector.load %arg4[%c0_5, %c0_6] : memref<8x128xf32, #tpu.memory_space<vmem>>, vector<8x128xf32>
    %7 = arith.addf %5, %6 : vector<8x128xf32>
    %8 = arith.mulf %7, %7 : vector<8x128xf32>
    %9 = tpu.concatenate %7, %8 in 0 : vector<8x128xf32>, vector<8x128xf32> -> vector<16x128xf32>
    %c0_7 = arith.constant 0 : index
    %c0_8 = arith.constant 0 : index
    %10 = vector.load %arg7[%c0_7, %c0_8] : memref<128x128xf32, #tpu.memory_space<vmem>>, vector<128x128xf32>
    %cst_9 = arith.constant dense<0.000000e+00> : vector<16x128xf32>
    %11 = tpu.matmul %9, %10, %cst_9 {dimension_numbers = #tpu.dot_dimension_numbers<[1], [0], [0], [1], [0, 0, 1, 1], [], []>} : vector<16x128xf32>, vector<128x128xf32>, vector<16x128xf32> -> vector<16x128xf32>
    %cst_10 = arith.constant 3.125000e-02 : f32
    %12 = vector.broadcast %cst_10 : f32 to vector<16x128xf32>
    %13 = arith.mulf %11, %12 : vector<16x128xf32>
    %14 = vector.extract_strided_slice %13 {offsets = [0, 0], sizes = [8, 128], strides = [1, 1]} : vector<16x128xf32> to vector<8x128xf32>
    %15 = vector.extract_strided_slice %13 {offsets = [8, 0], sizes = [8, 128], strides = [1, 1]} : vector<16x128xf32> to vector<8x128xf32>
    %16 = arith.mulf %14, %14 : vector<8x128xf32>
    %17 = arith.subf %15, %16 : vector<8x128xf32>
    %cst_11 = arith.constant 0.000000e+00 : f32
    %18 = vector.broadcast %cst_11 : f32 to vector<8x128xf32>
    %19 = arith.maximumf %17, %18 : vector<8x128xf32>
    %cst_12 = arith.constant 9.99999996E-13 : f32
    %20 = vector.broadcast %cst_12 : f32 to vector<8x128xf32>
    %21 = arith.addf %19, %20 : vector<8x128xf32>
    %22 = math.rsqrt %21 : vector<8x128xf32>
    %23 = arith.subf %7, %14 : vector<8x128xf32>
    %24 = arith.mulf %23, %22 : vector<8x128xf32>
    %c0_13 = arith.constant 0 : index
    %c0_14 = arith.constant 0 : index
    %25 = vector.load %arg5[%c0_13, %c0_14] : memref<1x128xf32, #tpu.memory_space<vmem>>, vector<1x128xf32>
    %26 = vector.broadcast %25 : vector<1x128xf32> to vector<8x128xf32>
    %27 = arith.mulf %24, %26 : vector<8x128xf32>
    %c0_15 = arith.constant 0 : index
    %c0_16 = arith.constant 0 : index
    %28 = vector.load %arg6[%c0_15, %c0_16] : memref<1x128xf32, #tpu.memory_space<vmem>>, vector<1x128xf32>
    %29 = vector.broadcast %28 : vector<1x128xf32> to vector<8x128xf32>
    %30 = arith.addf %27, %29 : vector<8x128xf32>
    %c0_17 = arith.constant 0 : index
    %c0_18 = arith.constant 0 : index
    %31 = vector.load %arg8[%c0_17, %c0_18] : memref<8x128xf32, #tpu.memory_space<vmem>>, vector<8x128xf32>
    tpu.vector_store %arg8[%c0_17, %c0_18], %30 {strides = array<i32>} : memref<8x128xf32, #tpu.memory_space<vmem>>, vector<8x128xf32>,
    return
  }
  func.func @transform_0(%arg0: i32) -> (i32, i32) {
    %c0_i32 = arith.constant 0 : i32
    %c0_i32_0 = arith.constant 0 : i32
    return %arg0, %c0_i32 : i32, i32
  }
  func.func @transform_1(%arg0: i32) -> (i32, i32) {
    %c0_i32 = arith.constant 0 : i32
    %c0_i32_0 = arith.constant 0 : i32
    %c0_i32_1 = arith.constant 0 : i32
    return %c0_i32, %c0_i32_0 : i32, i32
  }
  func.func @transform_2(%arg0: i32) -> (i32, i32) {
    %c0_i32 = arith.constant 0 : i32
    %c0_i32_0 = arith.constant 0 : i32
    %c0_i32_1 = arith.constant 0 : i32
    return %c0_i32, %c0_i32_0 : i32, i32
  }
  func.func @transform_3(%arg0: i32) -> (i32, i32) {
    %c0_i32 = arith.constant 0 : i32
    %c0_i32_0 = arith.constant 0 : i32
    return %arg0, %c0_i32 : i32, i32
  }
  func.func @transform_4(%arg0: i32) -> (i32, i32) {
    %c0_i32 = arith.constant 0 : i32
    %c0_i32_0 = arith.constant 0 : i32
    %c0_i32_1 = arith.constant 0 : i32
    return %c0_i32, %c0_i32_0 : i32, i32
  }
  func.func @transform_5(%arg0: i32) -> (i32, i32) {
    %c0_i32 = arith.constant 0 : i32
    %c0_i32_0 = arith.constant 0 : i32
    %c0_i32_1 = arith.constant 0 : i32
    return %c0_i32, %c0_i32_0 : i32, i32
  }
  func.func @transform_6(%arg0: i32) -> (i32, i32) {
    %c0_i32 = arith.constant 0 : i32
    %c0_i32_0 = arith.constant 0 : i32
    %c0_i32_1 = arith.constant 0 : i32
    return %c0_i32, %c0_i32_0 : i32, i32
  }
  func.func @transform_7(%arg0: i32) -> (i32, i32) {
    %c0_i32 = arith.constant 0 : i32
    %c0_i32_0 = arith.constant 0 : i32
    return %arg0, %c0_i32 : i32, i32
  }
}

</mosaic_0001>

<bundles_post_ra>
// kernel: _costeff_apply.1
= control target key start
LH: loop header
LB: loop body
LE: loop exit
PB: predicated region body
PF: predicated region fallthrough
CT: control target
= control target key end

     0   :  { %s597_s24 = smov 0   ;;  %s788_s0 = inlined_call_operand.vmem [shape: f32[28,256], index: 0, kind: input, shape index: {}]   ;;  %s789_s1 = inlined_call_operand.vmem [shape: f32[256,128], index: 1, kind: input, shape index: {}]   ;;  %s790_s2 = inlined_call_operand.vmem [shape: f32[1,128], index: 2, kind: input, shape index: {}]   ;;  %s791_s3 = inlined_call_operand.vmem [shape: f32[28,128], index: 3, kind: input, shape index: {}]   ;;  %s792_s4 = inlined_call_operand.vmem [shape: f32[1,128], index: 4, kind: input, shape index: {}]   ;;  %s793_s5 = inlined_call_operand.vmem [shape: f32[1,128], index: 5, kind: input, shape index: {}]   ;;  %s794_s6 = inlined_call_operand.vmem [shape: f32[128,128], index: 6, kind: input, shape index: {}]   ;;  %s795_s7 = inlined_call_operand.vmem [shape: f32[28,128], index: 7, kind: output, shape index: {}]  }
   0x1 LB: > { %s508_s25 = sadd.s32 4294967295, %s555_s24   ;;  %p512_p0 = scmp.ge.s32.totalorder %s555_s24, 1  ;;  %s555_s24 = sphi %s597_s24, %s17_s24  }
   0x2   : > { %p246_p1 = scmp.lt.s32.totalorder %s555_s24, 5 }
   0x4   : > { %p247_p2 = pnand %p512_p0, %p246_p1 }
   0x5   : > { %p673_p3 = scmp.lt.s32.totalorder (!%p247_p2), %s508_s25, 3 }
   0x6   : > { %250 = sbr.rel (%p247_p2) target bundleno = 342 (0x156), region = 48 }
   0xb   : > { %v311_v0 = vld [vmem:[%s789_s1 + $0x78] sm:$0xff]  ;;  %v310_v1 = vld [vmem:[%s789_s1 + $0x70] sm:$0xff]  ;;  %v309_v4 = vld [vmem:[%s789_s1 + $0x68] sm:$0xff]  ;;  %s798_s25 = smov (!%p673_p3, %s508_s25), 3 }
   0xc   : > { %v327_v2 = vld [vmem:[%s789_s1 + $0xf8] sm:$0xff]  ;;  %332 = vmatpush.msra.mxu0 %v311_v0  ;;  %v326_v3 = vld [vmem:[%s789_s1 + $0xf0] sm:$0xff]  ;;  %v325_v5 = vld [vmem:[%s789_s1 + $0xe8] sm:$0xff]  ;;  %s519_s30 = sshll.u32 %s798_s25, 4  ;;  %s515_s20 = sshll.u32 %s798_s25, 3 }
   0xd   : > { %352 = vmatpush.msra.mxu1 %v327_v2  ;;  %v308_v6 = vld [vmem:[%s789_s1 + $0x60] sm:$0xff]  ;;  %v307_v8 = vld [vmem:[%s789_s1 + $0x58] sm:$0xff]  ;;  %v306_v10 = vld [vmem:[%s789_s1 + $0x50] sm:$0xff]  ;;  %s285_s22 = scalar_lea.vmem %s788_s0, %s519_s30  ;;  %s289_s27 = scalar_lea.vmem %s791_s3, %s515_s20 }
   0xe   : > { %333 = vmatpush.msra.mxu0 %v310_v1  ;;  %v324_v7 = vld [vmem:[%s789_s1 + $0xe0] sm:$0xff]  ;;  %v323_v9 = vld [vmem:[%s789_s1 + $0xd8] sm:$0xff]  ;;  %v322_v11 = vld [vmem:[%s789_s1 + $0xd0] sm:$0xff]  ;;  %s293_s11 = scalar_lea.vmem %s795_s7, %s515_s20 }
   0xf   : > { %353 = vmatpush.msra.mxu1 %v326_v3  ;;  %v305_v12 = vld [vmem:[%s789_s1 + $0x48] sm:$0xff]  ;;  %v390_v14 = vld [vmem:[%s794_s6 + $0x78] sm:$0xff]  ;;  %v389_v15 = vld [vmem:[%s794_s6 + $0x70] sm:$0xff] }
  0x10   : > { %334 = vmatpush.msra.mxu0 %v309_v4  ;;  %v321_v13 = vld [vmem:[%s789_s1 + $0xc8] sm:$0xff]  ;;  %v304_v16 = vld [vmem:[%s789_s1 + $0x40] sm:$0xff]  ;;  %391 = vmatpush.msra.mxu2 %v390_v14  ;;  %v303_v19 = vld [vmem:[%s789_s1 + $0x38] sm:$0xff] }
  0x11   : > { %354 = vmatpush.msra.mxu1 %v325_v5  ;;  %v320_v17 = vld [vmem:[%s789_s1 + $0xc0] sm:$0xff]  ;;  %520 = vmatpush.msra.mxu3 %v390_v14  ;;  %v388_v18 = vld [vmem:[%s794_s6 + $0x68] sm:$0xff]  ;;  %v319_v20 = vld [vmem:[%s789_s1 + $0xb8] sm:$0xff] }
  0x12   : > { %335 = vmatpush.msra.mxu0 %v308_v6  ;;  %392 = vmatpush.msra.mxu2 %v389_v15  ;;  %v302_v21 = vld [vmem:[%s789_s1 + $0x30] sm:$0xff]  ;;  %v387_v22 = vld [vmem:[%s794_s6 + $0x60] sm:$0xff]  ;;  %v386_v24 = vld [vmem:[%s794_s6 + $0x58] sm:$0xff] }
  0x13   : > { %355 = vmatpush.msra.mxu1 %v324_v7  ;;  %521 = vmatpush.msra.mxu3 %v389_v15  ;;  %v318_v23 = vld [vmem:[%s789_s1 + $0xb0] sm:$0xff]  ;;  %v301_v25 = vld [vmem:[%s789_s1 + $0x28] sm:$0xff]  ;;  %v300_v28 = vld [vmem:[%s789_s1 + $0x20] sm:$0xff] }
  0x14   : > { %336 = vmatpush.msra.mxu0 %v307_v8  ;;  %393 = vmatpush.msra.mxu2 %v388_v18  ;;  %v317_v26 = vld [vmem:[%s789_s1 + $0xa8] sm:$0xff]  ;;  %v385_v27 = vld [vmem:[%s794_s6 + $0x50] sm:$0xff]  ;;  %v316_v29 = vld [vmem:[%s789_s1 + $0xa0] sm:$0xff] }
  0x15   : > { %356 = vmatpush.msra.mxu1 %v323_v9  ;;  %522 = vmatpush.msra.mxu3 %v388_v18  ;;  %v384_v30 = vld [vmem:[%s794_s6 + $0x48] sm:$0xff]  ;;  %v299_v31 = vld [vmem:[%s789_s1 + $0x18] sm:$0xff]  ;;  %v383_v33 = vld [vmem:[%s794_s6 + $0x40] sm:$0xff] }
  0x16   : > { %337 = vmatpush.msra.mxu0 %v306_v10  ;;  %394 = vmatpush.msra.mxu2 %v387_v22  ;;  %v315_v32 = vld [vmem:[%s789_s1 + $0x98] sm:$0xff]  ;;  %v298_v34 = vld [vmem:[%s789_s1 + $0x10] sm:$0xff]  ;;  %v297_v37 = vld [vmem:[%s789_s1 + $0x8] sm:$0xff] }
  0x17   : > { %357 = vmatpush.msra.mxu1 %v322_v11  ;;  %523 = vmatpush.msra.mxu3 %v387_v22  ;;  %v314_v35 = vld [vmem:[%s789_s1 + $0x90] sm:$0xff]  ;;  %v382_v36 = vld [vmem:[%s794_s6 + $0x38] sm:$0xff]  ;;  %v313_v38 = vld [vmem:[%s789_s1 + $0x88] sm:$0xff] }
  0x18   : > { %338 = vmatpush.msra.mxu0 %v305_v12  ;;  %395 = vmatpush.msra.mxu2 %v386_v24  ;;  %v381_v39 = vld [vmem:[%s794_s6 + $0x30] sm:$0xff]  ;;  %v296_v40 = vld [vmem:[%s789_s1] sm:$0xff]  ;;  %v295_v43 = vld [vmem:[%s285_s22 + $0x8] sm:$0xff] }
  0x19   : > { %358 = vmatpush.msra.mxu1 %v321_v13  ;;  %524 = vmatpush.msra.mxu3 %v386_v24  ;;  %v312_v41 = vld [vmem:[%s789_s1 + $0x80] sm:$0xff]  ;;  %v380_v44 = vld [vmem:[%s794_s6 + $0x28] sm:$0xff]  ;;  %v378_v46 = vld [vmem:[%s794_s6 + $0x18] sm:$0xff] }
  0x1a   : > { %339 = vmatpush.msra.mxu0 %v304_v16  ;;  %396 = vmatpush.msra.mxu2 %v385_v27  ;;  %v294_v42 = vld [vmem:[%s285_s22] sm:$0xff]  ;;  %v377_v47 = vld [vmem:[%s794_s6 + $0x10] sm:$0xff]  ;;  %v376_v48 = vld [vmem:[%s794_s6 + $0x8] sm:$0xff] }
  0x1b   : > { %359 = vmatpush.msra.mxu1 %v320_v17  ;;  %525 = vmatpush.msra.mxu3 %v385_v27  ;;  %v379_v45 = vld [vmem:[%s794_s6 + $0x20] sm:$0xff] }
  0x1c   : > { %340 = vmatpush.msra.mxu0 %v303_v19  ;;  %397 = vmatpush.msra.mxu2 %v384_v30  ;;  %v375_v49 = vld [vmem:[%s794_s6] sm:$0xff] }
  0x1d   : > { %360 = vmatpush.msra.mxu1 %v319_v20  ;;  %526 = vmatpush.msra.mxu3 %v384_v30  ;;  %v544_v50 = vld [vmem:[%s790_s2] ss:$0 sm:$0xff] }
  0x1e   : > { %341 = vmatpush.msra.mxu0 %v302_v21  ;;  %398 = vmatpush.msra.mxu2 %v383_v33  ;;  %v372_v54 = vld [vmem:[%s289_s27] sm:$0xff] }
  0x1f   : > { %361 = vmatpush.msra.mxu1 %v318_v23  ;;  %527 = vmatpush.msra.mxu3 %v383_v33  ;;  %v545_v9 = vld [vmem:[%s792_s4] ss:$0 sm:$0xff] }
  0x20   : > { %342 = vmatpush.msra.mxu0 %v301_v25  ;;  %399 = vmatpush.msra.mxu2 %v382_v36  ;;  %v546_v12 = vld [vmem:[%s793_s5] ss:$0 sm:$0xff] }
  0x21   : > { %362 = vmatpush.msra.mxu1 %v317_v26  ;;  %528 = vmatpush.msra.mxu3 %v382_v36 }
  0x22   : > { %343 = vmatpush.msra.mxu0 %v300_v28  ;;  %400 = vmatpush.msra.mxu2 %v381_v39 }
  0x23   : > { %363 = vmatpush.msra.mxu1 %v316_v29  ;;  %529 = vmatpush.msra.mxu3 %v381_v39 }
  0x24   : > { %344 = vmatpush.msra.mxu0 %v299_v31  ;;  %401 = vmatpush.msra.mxu2 %v380_v44 }
  0x25   : > { %364 = vmatpush.msra.mxu1 %v315_v32  ;;  %530 = vmatpush.msra.mxu3 %v380_v44 }
  0x26   : > { %345 = vmatpush.msra.mxu0 %v298_v34  ;;  %402 = vmatpush.msra.mxu2 %v379_v45 }
  0x27   : > { %365 = vmatpush.msra.mxu1 %v314_v35  ;;  %531 = vmatpush.msra.mxu3 %v379_v45 }
  0x28   : > { %346 = vmatpush.msra.mxu0 %v297_v37  ;;  %403 = vmatpush.msra.mxu2 %v378_v46 }
  0x29   : > { %366 = vmatpush.msra.mxu1 %v313_v38  ;;  %532 = vmatpush.msra.mxu3 %v378_v46 }
  0x2a   : > { %347 = vmatpush.msra.mxu0 %v296_v40  ;;  %404 = vmatpush.msra.mxu2 %v377_v47 }
  0x2b   : > { %367 = vmatpush.msra.mxu1 %v312_v41  ;;  %348 = vmatmul.f32.vlgmr.msra.gmra.mxu0 %v294_v42 }
  0x2c   : > { %368 = vmatmul.f32.vlgmr.msra.gmra.mxu1 %v295_v43  ;;  %533 = vmatpush.msra.mxu3 %v377_v47 }
  0x2d   : > { %405 = vmatpush.msra.mxu2 %v376_v48 }
  0x2e   : > { %534 = vmatpush.msra.mxu3 %v376_v48 }
  0x2f   : > { %406 = vmatpush.msra.mxu2 %v375_v49 }
  0x30   : > { %535 = vmatpush.msra.mxu3 %v375_v49 }
  0xa8   : > { %v349_v51 = vpop.f32.mrf.mxu0 }
  0xa9   : > { %v369_v52 = vpop.f32.mrf.mxu1  ;;  %v350_v53 = vadd.f32 %v544_v50, %v349_v51 }
  0xab   : > { %v370_v55 = vadd.f32 %v369_v52, %v350_v53 }
  0xad   : > { %v373_v56 = vadd.f32 %v372_v54, %v370_v55 }
  0xaf   : > { %407 = vmatmul.f32.vlgmr.msra.gmra.mxu2 %v373_v56  ;;  %v374_v57 = vmul.f32 %v373_v56, %v373_v56 }
  0xb1   : > { %410 = vmatmul.f32.vlgmr.msra.gmra.mxu3 %v374_v57 }
 0x132   : > { %v408_v58 = vpop.f32.mrf.mxu2 }
 0x133   : > { %v414_v59 = vmul.f32 0.03125, %v408_v58 }
 0x134   : > { %v411_v60 = vpop.f32.mrf.mxu3 }
 0x135   : > { %v416_v61 = vmul.f32 %v414_v59, %v414_v59  ;;  %v415_v62 = vmul.f32 0.03125, %v411_v60  ;;  %v430_v8 = vsub.f32 %v373_v56, %v414_v59 }
 0x137   : > { %v417_v63 = vsub.f32 %v415_v62, %v416_v61 }
 0x139   : > { %v418_v0 = vmax.f32 %v417_v63, 0.0 }
 0x13b   : > { %v419_v1 = vadd.f32 1e-12, %v418_v0 }
 0x13d   : > { %547 = vrsqrt.f32 %v419_v1  ;;  %vm426_vm1 = vweird.f32 %v419_v1 }
 0x143   : > { %v548_v2 = vpop.eup %547 }
 0x144   : > { %v421_v3 = vmul.f32 %v548_v2, %v419_v1  ;;  %vm427_vm0 = vweird.f32 %v548_v2 }
 0x145   : > { %vm428_vm2 = vmor %vm426_vm1, %vm427_vm0 }
 0x146   : > { %v422_v4 = vmul.f32 %v548_v2, %v421_v3 }
 0x148   : > { %v423_v5 = vmul.f32 0.5, %v422_v4 }
 0x14a   : > { %v424_v6 = vsub.f32 1.5, %v423_v5 }
 0x14c   : > { %v425_v7 = vmul.f32 %v548_v2, %v424_v6 }
 0x14e   : > { %v429_v10 = vsel %vm428_vm2, %v548_v2, %v425_v7 }
 0x14f   : > { %v431_v11 = vmul.f32 %v430_v8, %v429_v10 }
 0x151   : > { %v436_v13 = vmul.f32 %v545_v9, %v431_v11 }
 0x153   : > { %v441_v14 = vadd.f32 %v546_v12, %v436_v13 }
 0x155   : > { %442 = vst [vmem:[%s293_s11] sm:$0xff] %v441_v14 }
 0x156 PF: > { %s17_s24 = sadd.s32 1, %s555_s24  }
 0x157   : > { %p14_p4 = scmp.ge.s32.totalorder %s17_s24, 6  }
 0x159   :  { %16 = sbr.rel (!%p14_p4) target bundleno = 1 (0x1), region = 81 }

</bundles_post_ra>
